<compile_context>
chip_gen: v7x
topology: tpu7x:2x2x1
jax: 0.10.0
libtpu: 0.0.40
codegen_flags: <defaults>
</compile_context>

<pallas_src>
import jax
import jax.numpy as jnp
from jax.experimental import pallas as pl
from jax.experimental.pallas import tpu as pltpu


def _round_up(n, m):
    return ((n + m - 1) // m) * m


def _selfatt_kernel(x_ref, wc_ref, b1_ref, wp_ref, o_ref, hist_ref):
    # x_ref:    (T_TILE, D)        input tile (batch b, time tile t)
    # wc_ref:   (D, H + L)         fused [W1 | Wa] weight (bf16)
    # b1_ref:   (1, H)             linear bias (f32)
    # wp_ref:   (H, D)             projection weight (bf16)
    # o_ref:    (T_TILE, D)        output tile
    # hist_ref: (PAD + T_TILE, D)  f32 scratch. Rows [PAD-(L-1), PAD) carry the
    #                              previous tile's p1 tail; rows [PAD, PAD+T_TILE)
    #                              hold this tile's p1 (sublane-aligned store).
    H = wp_ref.shape[0]
    L = wc_ref.shape[1] - H
    t_tile, D = x_ref.shape
    pad = hist_ref.shape[0] - t_tile
    t = pl.program_id(1)

    # New batch element -> zero the carried history (aligned full-pad store).
    if L > 1:
        @pl.when(t == 0)
        def _():
            hist_ref[0:pad, :] = jnp.zeros((pad, D), jnp.float32)

    x_f32 = x_ref[...].astype(jnp.float32)      # residual path (full precision)
    x_bf16 = x_f32.astype(jnp.bfloat16)         # MXU path

    # One fused MXU pass: [f1_pre | att_logits] = x @ [W1 | Wa]
    fused = jnp.dot(x_bf16, wc_ref[...], preferred_element_type=jnp.float32)
    f1 = jnp.maximum(fused[:, :H] + b1_ref[...], 0.0)        # (T_TILE, H)
    logits = fused[:, H:H + L]                                # (T_TILE, L)

    # p1 = relu(...) @ Wp  (bf16 inputs, f32 accumulation)
    p1 = jnp.dot(f1.astype(jnp.bfloat16), wp_ref[...],
                 preferred_element_type=jnp.float32)          # (T_TILE, D)

    # softmax over the L history taps (f32; EUP approximate reciprocal).
    m = jnp.max(logits, axis=-1, keepdims=True)
    e = jnp.exp(logits - m)
    att = e * pl.reciprocal(jnp.sum(e, axis=-1, keepdims=True), approx=True)

    # FSMN history sum:  out[t] = sum_i att[t, i] * p1[t - i]   (zero history)
    out = att[:, 0:1] * p1                                    # i = 0 (in-register)
    if L > 1:
        hist_ref[pad:pad + t_tile, :] = p1                    # aligned p1 store
        for i in range(1, L):                                 # static unroll (L small)
            out = out + att[:, i:i + 1] * hist_ref[pad - i:pad - i + t_tile, :]
        # Carry the last L-1 rows of this tile's p1 to the next time tile.
        hist_ref[pad - (L - 1):pad, :] = p1[t_tile - (L - 1):t_tile, :]

    o_ref[...] = (x_f32 + out).astype(o_ref.dtype)


def self_att_layer(x, w1, b1, wp, wa, *, t_tile=None, vmem_limit_bytes=None):
    """x: (B, T, D); w1: (D, H); b1: (H,); wp: (H, D); wa: (D, L).

    Weights are stored as (in_features, out_features), i.e. the transpose of
    PyTorch's nn.Linear.weight layout.
    """
    B, T, D = x.shape
    H = w1.shape[1]
    L = wa.shape[1]
    assert wp.shape == (H, D), "residual add requires output_dim == input_dim"
    assert wa.shape[0] == D and b1.shape == (H,)

    if t_tile is None:
        t_tile = T if T <= 256 else 256
    assert T % t_tile == 0, "T must be divisible by t_tile"
    assert t_tile == T or t_tile % 8 == 0, "t_tile must be a multiple of 8"

    # Fuse [W1 | Wa] so the tiny attention matmul shares the x MXU pass; cast
    # matmul weights to bf16 (accumulation stays f32 inside the kernel).
    wc = jnp.concatenate([w1, wa], axis=1).astype(jnp.bfloat16)   # (D, H+L)
    wp_bf16 = wp.astype(jnp.bfloat16)                             # (H, D)
    b1_2d = b1.reshape(1, H).astype(jnp.float32)

    # Carry pad rounded up to a sublane multiple (>= 8) so the per-tile p1
    # store and the t==0 zero-init are aligned.
    pad = max(8, _round_up(L - 1, 8))

    compiler_kwargs = dict(dimension_semantics=("parallel", "arbitrary"))
    if vmem_limit_bytes is not None:
        compiler_kwargs["vmem_limit_bytes"] = vmem_limit_bytes

    return pl.pallas_call(
        _selfatt_kernel,
        out_shape=jax.ShapeDtypeStruct((B, T, D), x.dtype),
        grid=(B, T // t_tile),
        in_specs=[
            pl.BlockSpec((None, t_tile, D), lambda b, t: (b, t, 0)),  # x tile
            pl.BlockSpec((D, H + L), lambda b, t: (0, 0)),            # [W1 | Wa]
            pl.BlockSpec((1, H), lambda b, t: (0, 0)),                # b1
            pl.BlockSpec((H, D), lambda b, t: (0, 0)),                # Wp
        ],
        out_specs=pl.BlockSpec((None, t_tile, D), lambda b, t: (b, t, 0)),
        scratch_shapes=[pltpu.VMEM((pad + t_tile, D), jnp.float32)],
        compiler_params=pltpu.CompilerParams(**compiler_kwargs),
    )(x, wc, b1_2d, wp_bf16)


def _reference_f32(x, w1, b1, wp, wa):
    """Pure-JAX f32 replica of the PyTorch forward."""
    L = wa.shape[1]
    f1 = jax.nn.relu(x @ w1 + b1)
    p1 = f1 @ wp
    att = jax.nn.softmax(x @ wa, axis=-1)
    B, T, D = x.shape
    p1_pad = jnp.concatenate([jnp.zeros((B, L - 1, D), p1.dtype), p1], axis=1)
    out = jnp.zeros((B, T, D), p1.dtype)
    for i in range(L):
        out = out + att[:, :, i:i + 1] * p1_pad[:, L - 1 - i:L - 1 - i + T, :]
    return x + out


def _reference_bf16_matmul(x, w1, b1, wp, wa):
    """Same math with the kernel's bf16-matmul / f32-accumulate numerics."""
    H = w1.shape[1]
    L = wa.shape[1]
    bf = jnp.bfloat16
    wc = jnp.concatenate([w1, wa], axis=1).astype(bf)
    fused = jnp.dot(x.astype(bf), wc, preferred_element_type=jnp.float32)
    f1 = jax.nn.relu(fused[..., :H] + b1.astype(jnp.float32))
    logits = fused[..., H:]
    p1 = jnp.dot(f1.astype(bf), wp.astype(bf), preferred_element_type=jnp.float32)
    att = jax.nn.softmax(logits, axis=-1)
    B, T, D = x.shape
    p1_pad = jnp.concatenate([jnp.zeros((B, L - 1, D), jnp.float32), p1], axis=1)
    out = jnp.zeros((B, T, D), jnp.float32)
    for i in range(L):
        out = out + att[:, :, i:i + 1] * p1_pad[:, L - 1 - i:L - 1 - i + T, :]
    return x + out.astype(x.dtype)


if __name__ == "__main__":
    # Small, module-consistent, lane-friendly shapes:
    #   input_dim = output_dim = D (residual add), hidden_size = H, lorder = L.
    B, T, D, H, L = 2, 64, 128, 128, 4
    T_TILE = 16   # 4 time tiles per batch element -> exercises the carried history

    key = jax.random.PRNGKey(0)
    kx, k1, kb, kp, ka = jax.random.split(key, 5)
    x = jax.random.normal(kx, (B, T, D), dtype=jnp.float32)
    w1 = jax.random.normal(k1, (D, H), dtype=jnp.float32) * 0.1   # linear.weight.T
    b1 = jax.random.normal(kb, (H,), dtype=jnp.float32) * 0.1     # linear.bias
    wp = jax.random.normal(kp, (H, D), dtype=jnp.float32) * 0.1   # project.weight.T
    wa = jax.random.normal(ka, (D, L), dtype=jnp.float32) * 0.1   # att.weight.T

    out = self_att_layer(x, w1, b1, wp, wa, t_tile=T_TILE)
    out = jax.block_until_ready(out)
    assert out.shape == (B, T, D)

    ref_bf16 = _reference_bf16_matmul(x, w1, b1, wp, wa)
    assert jnp.allclose(out, ref_bf16, atol=2e-2, rtol=2e-2), \
        "mismatch vs bf16-matmul reference"

    ref_f32 = _reference_f32(x, w1, b1, wp, wa)
    assert jnp.allclose(out, ref_f32, atol=1e-1, rtol=1e-1), \
        "mismatch vs f32 reference"

    print("KERNEL_OK")
</pallas_src>

<mosaic_0001>
module attributes {stable_mosaic.version = 11 : i64} {
  func.func @_selfatt_kernel(%arg0: i32, %arg1: i32, %arg2: memref<1x16x128xf32, #tpu.memory_space<vmem>>, %arg3: memref<128x132xbf16, #tpu.memory_space<vmem>>, %arg4: memref<1x128xf32, #tpu.memory_space<vmem>>, %arg5: memref<128x128xbf16, #tpu.memory_space<vmem>>, %arg6: memref<1x16x128xf32, #tpu.memory_space<vmem>>, %arg7: memref<24x128xf32, #tpu.memory_space<vmem>>) attributes {dimension_semantics = [#tpu.dimension_semantics<parallel>, #tpu.dimension_semantics<arbitrary>], iteration_bounds = array<i64: 2, 4>, scalar_prefetch = 0 : i64, scratch_operands = 1 : i64, tpu.core_type = #tpu.core_type<tc>, window_params = [{transform_indices = @transform_0, window_bounds = array<i64: 1, 16, 128>}, {pipeline_mode = #tpu.pipeline_mode<synchronous>, transform_indices = @transform_1, window_bounds = array<i64: 128, 132>}, {pipeline_mode = #tpu.pipeline_mode<synchronous>, transform_indices = @transform_2, window_bounds = array<i64: 1, 128>}, {pipeline_mode = #tpu.pipeline_mode<synchronous>, transform_indices = @transform_3, window_bounds = array<i64: 128, 128>}, {transform_indices = @transform_4, window_bounds = array<i64: 1, 16, 128>}]} {
    %c0_i32 = arith.constant 0 : i32
    %0 = arith.cmpi eq, %arg1, %c0_i32 : i32
    %1 = arith.extui %0 : i1 to i32
    %c0_i32_0 = arith.constant 0 : i32
    %2 = arith.cmpi ne, %1, %c0_i32_0 : i32
    scf.if %2 {
      %cst_22 = arith.constant 0.000000e+00 : f32
      %53 = vector.broadcast %cst_22 : f32 to vector<8x128xf32>
      %c0_23 = arith.constant 0 : index
      %c0_24 = arith.constant 0 : index
      %54 = vector.load %arg7[%c0_23, %c0_24] : memref<24x128xf32, #tpu.memory_space<vmem>>, vector<8x128xf32>
      tpu.vector_store %arg7[%c0_23, %c0_24], %53 {strides = array<i32>} : memref<24x128xf32, #tpu.memory_space<vmem>>, vector<8x128xf32>,
    } else {
    }
    %c0 = arith.constant 0 : index
    %c0_1 = arith.constant 0 : index
    %c0_2 = arith.constant 0 : index
    %3 = vector.load %arg2[%c0, %c0_1, %c0_2] : memref<1x16x128xf32, #tpu.memory_space<vmem>>, vector<1x16x128xf32>
    %4 = vector.shape_cast %3 : vector<1x16x128xf32> to vector<16x128xf32>
    %5 = arith.truncf %4 : vector<16x128xf32> to vector<16x128xbf16>
    %c0_3 = arith.constant 0 : index
    %c0_4 = arith.constant 0 : index
    %6 = vector.load %arg3[%c0_3, %c0_4] : memref<128x132xbf16, #tpu.memory_space<vmem>>, vector<128x132xbf16>
    %cst = arith.constant dense<0.000000e+00> : vector<16x132xf32>
    %7 = tpu.matmul %5, %6, %cst {dimension_numbers = #tpu.dot_dimension_numbers<[1], [0], [0], [1], [0, 0, 1, 1], [], []>} : vector<16x128xbf16>, vector<128x132xbf16>, vector<16x132xf32> -> vector<16x132xf32>
    %8 = vector.extract_strided_slice %7 {offsets = [0, 0], sizes = [16, 128], strides = [1, 1]} : vector<16x132xf32> to vector<16x128xf32>
    %c0_5 = arith.constant 0 : index
    %c0_6 = arith.constant 0 : index
    %9 = vector.load %arg4[%c0_5, %c0_6] : memref<1x128xf32, #tpu.memory_space<vmem>>, vector<1x128xf32>
    %10 = vector.broadcast %9 : vector<1x128xf32> to vector<16x128xf32>
    %11 = arith.addf %8, %10 : vector<16x128xf32>
    %cst_7 = arith.constant 0.000000e+00 : f32
    %12 = vector.broadcast %cst_7 : f32 to vector<16x128xf32>
    %13 = arith.maximumf %11, %12 : vector<16x128xf32>
    %14 = vector.extract_strided_slice %7 {offsets = [0, 128], sizes = [16, 4], strides = [1, 1]} : vector<16x132xf32> to vector<16x4xf32>
    %15 = arith.truncf %13 : vector<16x128xf32> to vector<16x128xbf16>
    %c0_8 = arith.constant 0 : index
    %c0_9 = arith.constant 0 : index
    %16 = vector.load %arg5[%c0_8, %c0_9] : memref<128x128xbf16, #tpu.memory_space<vmem>>, vector<128x128xbf16>
    %cst_10 = arith.constant dense<0.000000e+00> : vector<16x128xf32>
    %17 = tpu.matmul %15, %16, %cst_10 {dimension_numbers = #tpu.dot_dimension_numbers<[1], [0], [0], [1], [0, 0, 1, 1], [], []>} : vector<16x128xbf16>, vector<128x128xbf16>, vector<16x128xf32> -> vector<16x128xf32>
    %cst_11 = arith.constant dense<0xFF800000> : vector<16xf32>
    %18 = vector.multi_reduction <maximumf>, %14, %cst_11 [1] : vector<16x4xf32> to vector<16xf32>
    %19 = vector.shape_cast %18 : vector<16xf32> to vector<16x1xf32>
    %20 = vector.broadcast %19 : vector<16x1xf32> to vector<16x4xf32>
    %21 = arith.subf %14, %20 : vector<16x4xf32>
    %22 = math.exp %21 : vector<16x4xf32>
    %cst_12 = arith.constant dense<0.000000e+00> : vector<16xf32>
    %23 = vector.multi_reduction <add>, %22, %cst_12 [1] : vector<16x4xf32> to vector<16xf32>
    %24 = vector.shape_cast %23 : vector<16xf32> to vector<16x1xf32>
    %25 = tpu.reciprocal %24 {approx = true} : vector<16x1xf32> -> vector<16x1xf32>
    %26 = vector.broadcast %25 : vector<16x1xf32> to vector<16x4xf32>
    %27 = arith.mulf %22, %26 : vector<16x4xf32>
    %28 = vector.extract_strided_slice %27 {offsets = [0, 0], sizes = [16, 1], strides = [1, 1]} : vector<16x4xf32> to vector<16x1xf32>
    %29 = vector.broadcast %28 : vector<16x1xf32> to vector<16x128xf32>
    %30 = arith.mulf %29, %17 : vector<16x128xf32>
    %c8 = arith.constant 8 : index
    %c0_13 = arith.constant 0 : index
    %31 = vector.load %arg7[%c8, %c0_13] : memref<24x128xf32, #tpu.memory_space<vmem>>, vector<16x128xf32>
    tpu.vector_store %arg7[%c8, %c0_13], %17 {strides = array<i32>} : memref<24x128xf32, #tpu.memory_space<vmem>>, vector<16x128xf32>,
    %32 = vector.extract_strided_slice %27 {offsets = [0, 1], sizes = [16, 1], strides = [1, 1]} : vector<16x4xf32> to vector<16x1xf32>
    %c7 = arith.constant 7 : index
    %c0_14 = arith.constant 0 : index
    %33 = vector.load %arg7[%c7, %c0_14] : memref<24x128xf32, #tpu.memory_space<vmem>>, vector<16x128xf32>
    %34 = vector.broadcast %32 : vector<16x1xf32> to vector<16x128xf32>
    %35 = arith.mulf %34, %33 : vector<16x128xf32>
    %36 = arith.addf %30, %35 : vector<16x128xf32>
    %37 = vector.extract_strided_slice %27 {offsets = [0, 2], sizes = [16, 1], strides = [1, 1]} : vector<16x4xf32> to vector<16x1xf32>
    %c6 = arith.constant 6 : index
    %c0_15 = arith.constant 0 : index
    %38 = vector.load %arg7[%c6, %c0_15] : memref<24x128xf32, #tpu.memory_space<vmem>>, vector<16x128xf32>
    %39 = vector.broadcast %37 : vector<16x1xf32> to vector<16x128xf32>
    %40 = arith.mulf %39, %38 : vector<16x128xf32>
    %41 = arith.addf %36, %40 : vector<16x128xf32>
    %42 = vector.extract_strided_slice %27 {offsets = [0, 3], sizes = [16, 1], strides = [1, 1]} : vector<16x4xf32> to vector<16x1xf32>
    %c5 = arith.constant 5 : index
    %c0_16 = arith.constant 0 : index
    %43 = vector.load %arg7[%c5, %c0_16] : memref<24x128xf32, #tpu.memory_space<vmem>>, vector<16x128xf32>
    %44 = vector.broadcast %42 : vector<16x1xf32> to vector<16x128xf32>
    %45 = arith.mulf %44, %43 : vector<16x128xf32>
    %46 = arith.addf %41, %45 : vector<16x128xf32>
    %47 = vector.extract_strided_slice %17 {offsets = [13, 0], sizes = [3, 128], strides = [1, 1]} : vector<16x128xf32> to vector<3x128xf32>
    %c5_17 = arith.constant 5 : index
    %c0_18 = arith.constant 0 : index
    %48 = vector.load %arg7[%c5_17, %c0_18] : memref<24x128xf32, #tpu.memory_space<vmem>>, vector<3x128xf32>
    tpu.vector_store %arg7[%c5_17, %c0_18], %47 {strides = array<i32>} : memref<24x128xf32, #tpu.memory_space<vmem>>, vector<3x128xf32>,
    %49 = arith.addf %4, %46 : vector<16x128xf32>
    %c0_19 = arith.constant 0 : index
    %c0_20 = arith.constant 0 : index
    %c0_21 = arith.constant 0 : index
    %50 = vector.load %arg6[%c0_19, %c0_20, %c0_21] : memref<1x16x128xf32, #tpu.memory_space<vmem>>, vector<1x16x128xf32>
    %51 = vector.shape_cast %50 : vector<1x16x128xf32> to vector<16x128xf32>
    %52 = vector.shape_cast %49 : vector<16x128xf32> to vector<1x16x128xf32>
    tpu.vector_store %arg6[%c0_19, %c0_20, %c0_21], %52 {strides = array<i32>} : memref<1x16x128xf32, #tpu.memory_space<vmem>>, vector<1x16x128xf32>,
    return
  }
  func.func @transform_0(%arg0: i32, %arg1: i32) -> (i32, i32, i32) {
    %c0_i32 = arith.constant 0 : i32
    %c0_i32_0 = arith.constant 0 : i32
    return %arg0, %arg1, %c0_i32 : i32, i32, i32
  }
  func.func @transform_1(%arg0: i32, %arg1: i32) -> (i32, i32) {
    %c0_i32 = arith.constant 0 : i32
    %c0_i32_0 = arith.constant 0 : i32
    %c0_i32_1 = arith.constant 0 : i32
    return %c0_i32, %c0_i32_0 : i32, i32
  }
  func.func @transform_2(%arg0: i32, %arg1: i32) -> (i32, i32) {
    %c0_i32 = arith.constant 0 : i32
    %c0_i32_0 = arith.constant 0 : i32
    %c0_i32_1 = arith.constant 0 : i32
    return %c0_i32, %c0_i32_0 : i32, i32
  }
  func.func @transform_3(%arg0: i32, %arg1: i32) -> (i32, i32) {
    %c0_i32 = arith.constant 0 : i32
    %c0_i32_0 = arith.constant 0 : i32
    %c0_i32_1 = arith.constant 0 : i32
    return %c0_i32, %c0_i32_0 : i32, i32
  }
  func.func @transform_4(%arg0: i32, %arg1: i32) -> (i32, i32, i32) {
    %c0_i32 = arith.constant 0 : i32
    %c0_i32_0 = arith.constant 0 : i32
    return %arg0, %arg1, %c0_i32 : i32, i32, i32
  }
}

</mosaic_0001>

<bundles_post_ra>
// kernel: tpu_custom_call.1
= control target key start
LH: loop header
LB: loop body
LE: loop exit
PB: predicated region body
PF: predicated region fallthrough
CT: control target
= control target key end

     0   :  { %9 = vsyncpa [#allocation4], 0  ;;  %s1251_s0 = inlined_call_operand.vmem [shape: f32[2,64,128], index: 0, kind: input, shape index: {}]   ;;  %s1252_s1 = inlined_call_operand.vmem [shape: bf16[128,132], index: 1, kind: input, shape index: {}]   ;;  %s1253_s2 = inlined_call_operand.vmem [shape: f32[1,128], index: 2, kind: input, shape index: {}]   ;;  %s1254_s3 = inlined_call_operand.vmem [shape: bf16[128,128], index: 3, kind: input, shape index: {}]   ;;  %s1255_s4 = inlined_call_operand.hbm [shape: f32[2,64,128], index: 4, kind: output, shape index: {}]  }
   0x1   :  { %11 = vsyncpa [#allocation4 + $0x1], 0  ;;  %s1004_s15 = smov 0   ;;  %s1006_s16 = smov 0  }
   0x2   :  { %s1008_s17 = smov 0   ;;  %s1010_s18 = smov 0  }
   0x3   :  { %s1012_s19 = smov 0   ;;  %s1014_s20 = smov 0  }
   0x4   :  { %s1016_s21 = smov 0   ;;  %s1018_s22 = smov 0  }
   0x5 LB: > { %s674_s23 = sadd.s32 4294967295, %s967_s22   ;;  %s675_s24 = sadd.s32 4294967294, %s967_s22   ;;  %s967_s22 = sphi %s1018_s22, %s17_s22   ;;  %s963_s21 = sphi %s1016_s21, %s1266_s21   ;;  %s959_s20 = sphi %s1014_s20, %s1265_s20   ;;  %s955_s19 = sphi %s1012_s19, %s1264_s19   ;;  %s951_s18 = sphi %s1010_s18, %s1263_s18   ;;  %s947_s17 = sphi %s1008_s17, %s1262_s17   ;;  %s943_s16 = sphi %s1006_s16, %s1261_s16   ;;  %s939_s15 = sphi %s1004_s15, %s1260_s15  }
   0x6   : > { %s26_s25 = sadd.s32 1, %s959_s20  ;;  %s29_s26 = sadd.s32 1, %s963_s21 }
   0x7   : > { %p27_p0 = scmp.ge.s32.totalorder %s26_s25, 4  ;;  %p139_p1 = scmp.ne.s32.totalorder %s947_s17, %s943_s16 }
   0x8   : > { %p140_p2 = scmp.eq.s32.totalorder %s674_s23, 7  ;;  %p145_p5 = scmp.ne.s32.totalorder %s943_s16, %s939_s15 }
   0x9   : > { %s1268_s25 = smov (%p27_p0, %s26_s25), 0  ;;  %s1270_s26 = smov (!%p27_p0, %s29_s26), %s963_s21 }
   0xa   : > { %s125_s27 = ssub.s32 %s959_s20, %s1268_s25  ;;  %p1055_p3 = por %p140_p2, %p139_p1 }
   0xb   : > { %p31_p4 = scmp.ge.s32.totalorder %s1270_s26, 2  ;;  %p146_p6 = scmp.eq.s32.totalorder %s675_s24, 7 }
   0xc   : > { %p678_p7 = scmp.ge.s32.totalorder %s967_s22, 1  ;;  %p186_p9 = scmp.lt.s32.totalorder %s967_s22, 9 }
   0xd   : > { %s1272_s26 = smov (%p31_p4, %s1270_s26), 0  ;;  %p1064_p8 = por %p146_p6, %p145_p5 }
   0xe   : > { %s124_s30 = ssub.s32 %s963_s21, %s1272_s26  ;;  %s129_s5 = sadd.s32 1, %s947_s17 }
   0xf   : > { %s126_s6 = sor.u32 %s125_s27, %s124_s30  ;;  %p187_p10 = pnand %p678_p7, %p186_p9 }
  0x10   : > { %p127_p11 = scmp.eq.s32.totalorder %s126_s6, 0  ;;  %s1256_s8 = sand.u32 (!%p187_p10), 1, %s943_s16  }
  0x11   : > { %190 = sbr.rel (%p187_p10) target bundleno = 773 (0x305), region = 36  ;;  %s1077_s9 = sshll.u32 (!%p187_p10), %s951_s18, 1 }
  0x12   : > { %s1073_s7 = scalar_select %p127_p11, %s947_s17, %s129_s5  }
  0x13   : > { %s679_s10 = sshll.u32 (!%p187_p10), %s1256_s8, 4  ;;  %p217_p12 = scmp.lt.s32.totalorder (!%p187_p10), %s955_s19, 1 }
  0x14   : > { %p219_p13 = scmp.lt.s32.totalorder (!%p187_p10), %s1077_s9, 7  ;;  %s1090_s5 = scalar_lea.vmem (!%p187_p10), [#allocation3], %s679_s10 }
  0x15   : > { %p683_p0 = scmp.ne.s32.totalorder (!%p187_p10), %s951_s18, 0 }
  0x18   : > { %s218_s11 = scalar_select %p217_p12, %s955_s19, 1 }
  0x19   : > { %s220_s12 = scalar_select %p219_p13, %s1077_s9, 7 }
  0x1a   : > { %s681_s13 = sshll.u32 %s218_s11, 3  ;;  %231 = sbr.rel (%p683_p0) target bundleno = 33 (0x21), region = 40  ;;  %v969_v0 = vmov (!%p683_p0), 0.0  }
  0x1b   : > { %s222_s14 = sadd.s32 %s681_s13, %s220_s12  ;;  %232 = vst [vmem:[#allocation2] sm:$0xff] (!%p683_p0), %v969_v0 }
  0x1c   : > { %s682_s23 = sshll.u32 %s222_s14, 3 }
  0x1d   : > { %s1088_s30 = scalar_lea.vmem %s1251_s0, %s682_s23 }
  0x21 PF: > { %v833_v1 = vld [vmem:[%s1252_s1 + $0x4] ss:$8 sps:$4 sm:$0xff]   ;;  %v835_v2 = vld [vmem:[%s1252_s1] ss:$8 sps:$4 sm:$0xff]   ;;  %v970_v3 = vmov 0   ;;  %v971_v4 = vmov 0.0  }
  0x22   : > { %364 = vmatprep.mubr.bf16.mxu0 %v970_v3  ;;  %724 = vmatprep.subr.bf16.mxu1 %v971_v4  ;;  %v836_v5 = vld [vmem:[%s1252_s1 + $0x14] ss:$8 sps:$4 sm:$0xff]   ;;  %v838_v6 = vld [vmem:[%s1252_s1 + $0x10] ss:$8 sps:$4 sm:$0xff]   ;;  %v839_v7 = vld [vmem:[%s1252_s1 + $0x24] ss:$8 sps:$4 sm:$0xff]  }
  0x23   : > { %332 = vmatprep.subr.bf16.mxu0 %v833_v1  ;;  %824 = vset.pattern.permute.xlu0 %v970_v3  ;;  %v841_v8 = vld [vmem:[%s1252_s1 + $0x20] ss:$8 sps:$4 sm:$0xff]   ;;  %v842_v9 = vld [vmem:[%s1252_s1 + $0x34] ss:$8 sps:$4 sm:$0xff]   ;;  %v844_v10 = vld [vmem:[%s1252_s1 + $0x30] ss:$8 sps:$4 sm:$0xff]  }
  0x24   : > { %333 = vmatpush1.bf16.msra.mxu0 %v835_v2  ;;  %v845_v11 = vld [vmem:[%s1252_s1 + $0x44] ss:$8 sps:$4 sm:$0xff]   ;;  %v847_v14 = vld [vmem:[%s1252_s1 + $0x40] ss:$8 sps:$4 sm:$0xff]   ;;  %v848_v15 = vld [vmem:[%s1252_s1 + $0x54] ss:$8 sps:$4 sm:$0xff]  }
  0x25   : > { %334 = vmatprep.subr.bf16.mxu0 %v836_v5  ;;  %v857_v12 = vld [vmem:[%s1254_s3] sm:$0xff]   ;;  %v858_v13 = vld [vmem:[%s1254_s3 + $0x8] sm:$0xff]   ;;  %v859_v16 = vld [vmem:[%s1254_s3 + $0x10] sm:$0xff]   ;;  %vm972_vm0 = vmmov 0   ;;  %vm492_vm1 = vcmask 31744   ;;  %v973_v52 = vmov 1  }
  0x26   : > { %725 = vmatpush3.bf16.msra.mxu1 %v857_v12  ;;  %v850_v17 = vld [vmem:[%s1252_s1 + $0x50] ss:$8 sps:$4 sm:$0xff]   ;;  %v851_v18 = vld [vmem:[%s1252_s1 + $0x64] ss:$8 sps:$4 sm:$0xff]   ;;  %v853_v20 = vld [vmem:[%s1252_s1 + $0x60] ss:$8 sps:$4 sm:$0xff]   ;;  %740 = vmatprep.mubr.msk.bf16.mxu1 %vm972_vm0, %v971_v4 }
  0x27   : > { %726 = vmatprep.subr.bf16.mxu1 %v971_v4  ;;  %v860_v19 = vld [vmem:[%s1254_s3 + $0x18] sm:$0xff]   ;;  %v861_v22 = vld [vmem:[%s1254_s3 + $0x20] sm:$0xff]   ;;  %v1162_v25 = vld [vmem:[%s1088_s30 + $0x8] sm:$0xff]  ;;  %825 = vset.pattern.permute.xlu1 %v973_v52  ;;  %v974_v0 = vmov 2   ;;  %v975_v1 = vmov 3   ;;  %s711_s18 = sshll.u32 %s955_s19, 3 }
  0x28   : > { %335 = vmatpush1.bf16.msra.mxu0 %v838_v6  ;;  %v854_v21 = vld [vmem:[%s1252_s1 + $0x74] ss:$8 sps:$4 sm:$0xff]   ;;  %v856_v23 = vld [vmem:[%s1252_s1 + $0x70] ss:$8 sps:$4 sm:$0xff]   ;;  %v1159_v24 = vld [vmem:[%s1088_s30] sm:$0xff]  ;;  %s589_s13 = sadd.s32 %s711_s18, %s1077_s9  ;;  %s592_s14 = sshll.u32 %s1090_s5, 4  ;;  %s1193_s14 = int_to_ptr.vmem [resolvable:$true] %s592_s14 }
  0x29   : > { %336 = vmatprep.subr.bf16.mxu0 %v839_v7  ;;  %v235_v26 = vpack.c.bf16 %v1162_v25, %v1159_v24  ;;  %v862_v27 = vld [vmem:[%s1254_s3 + $0x28] sm:$0xff]   ;;  %v863_v28 = vld [vmem:[%s1254_s3 + $0x30] sm:$0xff]   ;;  %v864_v29 = vld [vmem:[%s1254_s3 + $0x38] sm:$0xff]   ;;  %s712_s8 = sshll.u32 %s589_s13, 7  ;;  %s1259_s19 = sand.u32 1, %s943_s16  }
  0x2a   : > { %727 = vmatpush3.bf16.msra.mxu1 %v858_v13  ;;  %v700_v30 = vld [vmem:[%s1253_s2] ss:$0 sm:$0xff]  ;;  %s1191_s27 = scalar_lea.hbm %s1255_s4, %s712_s8  ;;  %s1199_s9 = scalar_lea.sflag [#allocation4], %s1259_s19 }
  0x2b   : > { %728 = vmatprep.subr.bf16.mxu1 %v971_v4  ;;  %s873_s6 = scalar_lea.vmem %s1193_s14, 256  ;;  %s976_s30 = smov [#allocation3]  }
  0x2c   : > { %337 = vmatpush1.bf16.msra.mxu0 %v841_v8  ;;  %p874_p1 = scmp.ne.s32.totalorder %s1193_s14, %s873_s6  ;;  %s877_s11 = sshll.u32 %s976_s30, 4  ;;  %s878_s11 = int_to_ptr.vmem [resolvable:$false] %s877_s11 }
  0x2d   : > { %338 = vmatprep.subr.bf16.mxu0 %v842_v9  ;;  %s879_s12 = scalar_lea.vmem %s878_s11, 512  ;;  %p880_p5 = scmp.lt.s32.totalorder %s1193_s14, %s878_s11 }
  0x2e   : > { %729 = vmatpush3.bf16.msra.mxu1 %v859_v16  ;;  %p875_p2 = pnand %p874_p1, %p1055_p3  ;;  %p881_p6 = scmp.lt.s32.totalorder %s879_s12, %s873_s6 }
  0x2f   : > { %730 = vmatprep.subr.bf16.mxu1 %v971_v4 }
  0x30   : > { %339 = vmatpush1.bf16.msra.mxu0 %v844_v10  ;;  %p876_p4 = pneg %p875_p2  ;;  %p882_p7 = por %p881_p6, %p880_p5 }
  0x31   : > { %340 = vmatprep.subr.bf16.mxu0 %v845_v11 }
  0x32   : > { %731 = vmatpush3.bf16.msra.mxu1 %v860_v19  ;;  %p883_p9 = pnand %p882_p7, %p876_p4 }
  0x33   : > { %732 = vmatprep.subr.bf16.mxu1 %v971_v4 }
  0x34   : > { %341 = vmatpush1.bf16.msra.mxu0 %v847_v14 }
  0x35   : > { %342 = vmatprep.subr.bf16.mxu0 %v848_v15 }
  0x36   : > { %733 = vmatpush3.bf16.msra.mxu1 %v861_v22 }
  0x37   : > { %734 = vmatprep.subr.bf16.mxu1 %v971_v4 }
  0x38   : > { %343 = vmatpush1.bf16.msra.mxu0 %v850_v17 }
  0x39   : > { %344 = vmatprep.subr.bf16.mxu0 %v851_v18 }
  0x3a   : > { %735 = vmatpush3.bf16.msra.mxu1 %v862_v27 }
  0x3b   : > { %736 = vmatprep.subr.bf16.mxu1 %v971_v4 }
  0x3c   : > { %345 = vmatpush1.bf16.msra.mxu0 %v853_v20 }
  0x3d   : > { %346 = vmatprep.subr.bf16.mxu0 %v854_v21 }
  0x3e   : > { %737 = vmatpush3.bf16.msra.mxu1 %v863_v28 }
  0x3f   : > { %738 = vmatprep.subr.bf16.mxu1 %v971_v4 }
  0x40   : > { %347 = vmatpush1.bf16.msra.mxu0 %v856_v23 }
  0x42   : > { %739 = vmatpush3.bf16.msra.mxu1 %v864_v29 }
  0x43   : > { %365 = vmatmul.mubr.bf16.vlgmr.msra.gmra.mrb[0].mxu0 %v235_v26 }
 0x116   : > { %v366_v31 = vpop.f32.mrb[0].mxu0 }
 0x117   : > { %v382_v32 = vadd.f32 %v700_v30, %v366_v31  ;;  %v368_v33 = vpop.f32.mrb[1].mxu0 }
 0x118   : > { %v370_v34 = vpop.f32.mrb[2].mxu0  ;;  %v493_v35 = vsel %vm492_vm1, %v368_v33, -inf }
 0x119   : > { %v383_v36 = vadd.f32 %v700_v30, %v370_v34  ;;  %494 = vmax.xlane.f32.xlu0 %v493_v35  ;;  %v372_v37 = vpop.f32.mrb[3].mxu0  ;;  %v384_v38 = vmax.f32 %v382_v32, 0.0 }
 0x11a   : > { %v496_v40 = vsel %vm492_vm1, %v372_v37, -inf }
 0x11b   : > { %v385_v39 = vmax.f32 %v383_v36, 0.0 }
 0x11d   : > { %v386_v41 = vpack.c.bf16 %v385_v39, %v384_v38  ;;  %497 = vmax.xlane.f32.xlu0 %v496_v40 }
 0x11f   : > { %741 = vmatmul.mubr.bf16.vlgmr.msra.gmra.mrb[0].mxu1 %v386_v41 }
 0x1a6   : > { %v495_v42 = vpop.xlane.xlu0 %494 }
 0x1a7   : > { %v499_v43 = vsub.f32 %v368_v33, %v495_v42 }
 0x1a9   : > { %v501_v44 = vmul.f32 1.442695, %v499_v43 }
 0x1aa   : > { %v498_v45 = vpop.xlane.xlu0 %497 }
 0x1ab   : > { %865 = vpow2.f32 %v501_v44  ;;  %v500_v46 = vsub.f32 %v372_v37, %v498_v45 }
 0x1ad   : > { %v503_v47 = vmul.f32 1.442695, %v500_v46 }
 0x1af   : > { %867 = vpow2.f32 %v503_v47 }
 0x1b5   : > { %v866_v48 = vpop.eup %865 }
 0x1b6   : > { %v505_v49 = vsel %vm492_vm1, %v866_v48, 0.0 }
 0x1b7   : > { %506 = vadd.xlane.f32.xlu1 %v505_v49 }
 0x1b9   : > { %v868_v50 = vpop.eup %867 }
 0x1ba   : > { %v508_v51 = vsel %vm492_vm1, %v868_v50, 0.0 }
 0x1bb   : > { %509 = vadd.xlane.f32.xlu1 %v508_v51 }
 0x1f2   : > { %v485_v53 = vpop.f32.mrb[0].mxu1 }
 0x1f3   : > { %527 = vst [vmem:[#allocation2 + $0x8] sm:$0xff] %v485_v53  ;;  %v742_v54 = vpop.f32.mrb[1].mxu1 }
 0x1f4   : > { %v488_v55 = vpop.f32.mrb[2].mxu1 }
 0x1f5   : > { %528 = vst [vmem:[#allocation2 + $0x10] sm:$0xff] %v488_v55  ;;  %v743_v56 = vpop.f32.mrb[3].mxu1 }
 0x1fa   : > { %v529_v57 = vld [vmem:[#allocation2 + $0x7] sm:$0xff] }
 0x1fb   : > { %v543_v58 = vld [vmem:[#allocation2 + $0x6] sm:$0xff] }
 0x1fc   : > { %v557_v59 = vld [vmem:[#allocation2 + $0x5] sm:$0xff]  ;;  %v530_v18 = vld [vmem:[#allocation2 + $0xf] sm:$0xff] }
 0x1fd   : > { %571 = vst [vmem:[#allocation2] sm:$0xe0] %v488_v55  ;;  %v544_v21 = vld [vmem:[#allocation2 + $0xe] sm:$0xff] }
 0x1fe   : > { %v558_v27 = vld [vmem:[#allocation2 + $0xd] sm:$0xff] }
 0x244   : > { %v507_v60 = vpop.xlane.xlu1 %506 }
 0x245   : > { %869 = vrcp.f32 %v507_v60 }
 0x248   : > { %v510_v62 = vpop.xlane.xlu1 %509 }
 0x249   : > { %871 = vrcp.f32 %v510_v62 }
 0x24f   : > { %v870_v61 = vpop.eup %869 }
 0x250   : > { %v513_v63 = vmul.f32 %v870_v61, %v866_v48 }
 0x252   : > { %517 = vperm.xlu0 %824, %v513_v63   ;;  %532 = vperm.xlu1 %825, %v513_v63  }
 0x253   : > { %v872_v2 = vpop.eup %871 }
 0x254   : > { %v514_v4 = vmul.f32 %v872_v2, %v868_v50 }
 0x256   : > { %826 = vset.pattern.permute.xlu1 %v974_v0  ;;  %832 = vset.pattern.permute.xlu0 %v975_v1 }
 0x257   : > { %546 = vperm.xlu1 %826, %v513_v63  }
 0x25b   : > { %827 = vset.pattern.permute.xlu1 %v975_v1 }
 0x25c   : > { %560 = vperm.xlu1 %827, %v513_v63  }
 0x260   : > { %828 = vset.pattern.permute.xlu1 %v970_v3 }
 0x261   : > { %522 = vperm.xlu1 %828, %v514_v4  }
 0x265   : > { %829 = vset.pattern.permute.xlu1 %v973_v52 }
 0x266   : > { %536 = vperm.xlu1 %829, %v514_v4  }
 0x26a   : > { %830 = vset.pattern.permute.xlu1 %v974_v0 }
 0x26b   : > { %550 = vperm.xlu1 %830, %v514_v4  }
 0x26f   : > { %831 = vset.pattern.permute.xlu1 %v975_v1 }
 0x270   : > { %564 = vperm.xlu1 %831, %v514_v4  }
 0x2d1   : > { %v533_v5 = vpop.permute.xlu1 %532  ;;  %v518_v6 = vpop.permute.xlu0 %517 }
 0x2d2   : > { %v539_v7 = vmul.f32 %v533_v5, %v529_v57  ;;  %v525_v8 = vmul.f32 %v518_v6, %v485_v53 }
 0x2d4   : > { %v541_v11 = vadd.f32 %v539_v7, %v525_v8 }
 0x2d6   : > { %v547_v9 = vpop.permute.xlu1 %546 }
 0x2d7   : > { %v553_v10 = vmul.f32 %v547_v9, %v543_v58 }
 0x2d9   : > { %v555_v13 = vadd.f32 %v553_v10, %v541_v11 }
 0x2db   : > { %v561_v12 = vpop.permute.xlu1 %560 }
 0x2dc   : > { %v567_v3 = vmul.f32 %v561_v12, %v557_v59 }
 0x2de   : > { %v569_v14 = vadd.f32 %v567_v3, %v555_v13 }
 0x2e0   : > { %v572_v15 = vadd.f32 %v569_v14, %v1159_v24  ;;  %v523_v16 = vpop.permute.xlu1 %522 }
 0x2e1   : > { %v526_v22 = vmul.f32 %v523_v16, %v488_v55 }
 0x2e2   : > { %574 = vst [vmem:[%s1090_s5] sm:$0xff] %v572_v15 }
 0x2e5   : > { %v537_v17 = vpop.permute.xlu1 %536 }
 0x2e6   : > { %v540_v19 = vmul.f32 %v537_v17, %v530_v18 }
 0x2e8   : > { %v542_v26 = vadd.f32 %v540_v19, %v526_v22 }
 0x2ea   : > { %v551_v20 = vpop.permute.xlu1 %550 }
 0x2eb   : > { %v554_v23 = vmul.f32 %v551_v20, %v544_v21 }
 0x2ed   : > { %v556_v29 = vadd.f32 %v554_v23, %v542_v26 }
 0x2ef   : > { %v565_v28 = vpop.permute.xlu1 %564 }
 0x2f0   : > { %v568_v24 = vmul.f32 %v565_v28, %v558_v27 }
 0x2f2   : > { %v570_v30 = vadd.f32 %v568_v24, %v556_v29 }
 0x2f4   : > { %v573_v31 = vadd.f32 %v570_v30, %v1162_v25 }
 0x2f6   : > { %575 = vst [vmem:[%s1090_s5 + $0x8] sm:$0xff] %v573_v31 }
 0x2f7   : > { %886 = shalt.err (!%p883_p9)
}
 0x2f8   : > { %s887_s5 = scalar_lea.hbm %s1191_s27, 256  ;;  %s891_s13 = scalar_lea.hbm %s1255_s4, 2048 }
 0x2f9   : > { %p888_p10 = scmp.ne.s32.totalorder %s1191_s27, %s887_s5  ;;  %p892_p13 = scmp.lt.u32.totalorder %s1191_s27, %s1255_s4 }
 0x2fa   : > { %p893_p0 = scmp.lt.u32.totalorder %s891_s13, %s887_s5  ;;  %p895_p2 = scmp.lt.u32.totalorder %s887_s5, %s1191_s27 }
 0x2fb   : > { %p889_p11 = pnand %p888_p10, %p1055_p3 }
 0x2fc   : > { %p894_p1 = por %p893_p0, %p892_p13 }
 0x2fd   : > { %p890_p12 = pneg %p889_p11 }
 0x2fe   : > { %p896_p4 = por %p895_p2, %p894_p1 }
 0x300   : > { %p897_p5 = pnand %p896_p4, %p890_p12 }
 0x302   : > { %900 = shalt.err (!%p897_p5)
}
 0x303   : > { %s977_s24 = smov 128   ;;  %s978_s19 = smov 8  }
 0x304   : > { %744 = dma.vmem_to_hbm [thread:$0]  (%p1055_p3), %s1193_s14, 256, %s1191_s27, %s1199_s9, %s977_s24, %s977_s24, %s978_s19  }
 0x305 PF: > { %p750_p6 = scmp.ge.s32.totalorder %s967_s22, 2  ;;  %s607_s6 = sand.u32 1, %s939_s15  }
 0x306   : > { %s608_s30 = scalar_lea.sflag [#allocation4], %s607_s6 }
 0x307   : > { %p747_p7 = pnand %p750_p6, %p1064_p8 }
 0x309   : > { %934 = dma.done.wait (!%p747_p7), %s608_s30, 256  }
 0x30a   : > { %936 = vsyncadd (!%p747_p7), %s608_s30, 4294967040  ;;  %s17_s22 = sadd.s32 1, %s967_s22   ;;  %s1260_s15 = smov %s943_s16 }
 0x30b   : > { %p14_p9 = scmp.ge.s32.totalorder %s17_s22, 10   ;;  %s1261_s16 = smov %s947_s17 }
 0x30c   : > { %s1262_s17 = smov %s1073_s7  ;;  %s1263_s18 = smov %s959_s20 }
 0x30d   : > { %s1264_s19 = smov %s963_s21  ;;  %s1265_s20 = smov %s1268_s25 }
 0x30e   : > { %s1266_s21 = smov %s1272_s26  ;;  %16 = sbr.rel (!%p14_p9) target bundleno = 5 (0x5), region = 75 }
 0x315   :  { %613 = vsyncpa [#allocation4], 1 }
 0x316   :  { %615 = vsyncpa [#allocation4 + $0x1], 1 }

</bundles_post_ra>
